<compile_context>
chip_gen: v7x
topology: tpu7x:2x2x1
jax: 0.10.0
libtpu: 0.0.40
codegen_flags: <defaults>
</compile_context>

<pallas_src>
import functools

import jax
import jax.numpy as jnp
from jax.experimental import pallas as pl
from jax.experimental.pallas import tpu as pltpu

HID = 40          # hidden features (nn.Linear(input_size, 40))
OUT = 45          # output features (nn.Linear(40, 45))
W2_ROWS = 48      # HID padded to a sublane multiple (was 128 -> halves param DMA)
OUT_PAD = 128     # lane-dense output / hidden width
B1_PAD = 16       # rows reserved for b1 (keeps the bf16 w2 slice 16-row aligned)


def pack_params(w1, b1, w2, b2):
    """Pack PyTorch-layout params once into a single lane-dense bf16 slab.

    w1: (HID, F), b1: (HID,), w2: (OUT, HID), b2: (OUT,)
    Slab rows (all 128 lanes wide, zero padded):
      [0        : F        ]  w1^T   (F rows, HID valid cols)
      [F        : F+16     ]  b1 in row F, rest padding
      [F+16     : F+64     ]  w2^T   (HID valid rows of 48, OUT valid cols)
      [F+64     : F+80     ]  b2 in row F+64, rest padding
    Zero padding is exact: padded hidden lanes are tanh(0)=0 and padded w2 rows are 0,
    so they contribute nothing to the real outputs.
    """
    f = w1.shape[1]
    assert f % 16 == 0, "input_size must be a multiple of 16 for this bf16 slab layout"
    slab = jnp.zeros((f + B1_PAD + W2_ROWS + 16, OUT_PAD), jnp.float32)
    slab = slab.at[0:f, 0:HID].set(jnp.transpose(w1).astype(jnp.float32))
    slab = slab.at[f, 0:HID].set(b1.astype(jnp.float32))
    slab = slab.at[f + B1_PAD:f + B1_PAD + HID, 0:OUT].set(
        jnp.transpose(w2).astype(jnp.float32))
    slab = slab.at[f + B1_PAD + W2_ROWS, 0:OUT].set(b2.astype(jnp.float32))
    return slab.astype(jnp.bfloat16)


def _make_kernel(f, groups, group_size):
    off_b1 = f
    off_w2 = f + B1_PAD
    off_b2 = f + B1_PAD + W2_ROWS

    def network_kernel(x_ref, p_ref, o_ref):
        # Static slices into the resident parameter slab (zero runtime cost).
        w1 = p_ref[0:f, :]                                   # (F, 128)   bf16
        b1 = p_ref[off_b1:off_b1 + 1, :].astype(jnp.float32)  # (1, 128)
        w2 = p_ref[off_w2:off_w2 + W2_ROWS, :]               # (48, 128)  bf16
        b2 = p_ref[off_b2:off_b2 + 1, :].astype(jnp.float32)  # (1, 128)

        # hidden linear + tanh : bf16 MXU inputs, f32 accumulation.
        xb = x_ref[...].astype(jnp.bfloat16)
        h = jnp.tanh(jnp.dot(xb, w1, preferred_element_type=jnp.float32) + b1)
        # output linear : only the 48 meaningful hidden lanes (lanes 40..47 are tanh(0)=0).
        hb = h[:, :W2_ROWS].astype(jnp.bfloat16)
        z = jnp.dot(hb, w2, preferred_element_type=jnp.float32) + b2   # (rows, 128) f32

        # softmax over dim=0 of each independent forward (exactly nn.Softmax(dim=0)).
        # Exact divide: the approx reciprocal broke the "columns sum to 1" property at 1e-3
        # and the VPU/EUP are idle here anyway.
        if groups == 1:
            m = jnp.max(z, axis=0, keepdims=True)
            e = jnp.exp(z - m)
            o_ref[...] = (e / jnp.sum(e, axis=0, keepdims=True)).astype(o_ref.dtype)
        else:
            z3 = z.reshape(groups, group_size, OUT_PAD)
            m = jnp.max(z3, axis=1, keepdims=True)
            e = jnp.exp(z3 - m)
            s = e / jnp.sum(e, axis=1, keepdims=True)
            o_ref[...] = s.reshape(groups * group_size, OUT_PAD).astype(o_ref.dtype)

    return network_kernel


@jax.jit
def network_forward_padded(x, params):
    """Single module forward. x: (B, F) f32, params: bf16 slab. Returns lane-dense (B, 128)."""
    B, F = x.shape
    vmem = pl.BlockSpec(memory_space=pltpu.MemorySpace.VMEM)
    return pl.pallas_call(
        _make_kernel(F, 1, B),
        out_shape=jax.ShapeDtypeStruct((B, OUT_PAD), jnp.float32),
        in_specs=[vmem, vmem],
        out_specs=vmem,
    )(x, params)


@jax.jit
def network_forward(x, params):
    """(B, F) -> (B, 45). Prefer network_forward_padded at the consumer so the slice fuses."""
    return network_forward_padded(x, params)[:, :OUT]


@functools.partial(jax.jit, static_argnames=("group_size", "groups_per_tile"))
def network_forward_stacked(x, params, *, group_size, groups_per_tile=32):
    """Throughput path: N independent forwards stacked along rows.

    x: (N * group_size, F); each consecutive `group_size`-row block is one module forward
    (its own softmax over dim=0). Returns lane-dense (N * group_size, 128).
    Tiles always cover whole groups, so no padded rows contaminate any softmax.
    """
    rows, F = x.shape
    assert group_size % 8 == 0, "group_size must be a multiple of 8 (sublane tiling)"
    assert rows % group_size == 0, "rows must be a whole number of groups"
    n_groups = rows // group_size
    gpt = min(groups_per_tile, n_groups)
    while n_groups % gpt:            # largest divisor of n_groups not exceeding the request
        gpt -= 1
    tile_rows = gpt * group_size
    p_rows = params.shape[0]
    return pl.pallas_call(
        _make_kernel(F, gpt, group_size),
        out_shape=jax.ShapeDtypeStruct((rows, OUT_PAD), jnp.float32),
        grid=(n_groups // gpt,),
        in_specs=[
            pl.BlockSpec((tile_rows, F), lambda i: (i, 0)),
            pl.BlockSpec((p_rows, OUT_PAD), lambda i: (0, 0)),   # constant -> DMA'd once, resident
        ],
        out_specs=pl.BlockSpec((tile_rows, OUT_PAD), lambda i: (i, 0)),
        compiler_params=pltpu.CompilerParams(
            dimension_semantics=("parallel",)),   # shards the grid across v7x's 2 TCs
    )(x, params)


def _init_linear(key, out_features, in_features):
    # Deterministic init mimicking PyTorch's default U(-1/sqrt(fan_in), 1/sqrt(fan_in)).
    kw, kb = jax.random.split(key)
    bound = 1.0 / jnp.sqrt(jnp.float32(in_features))
    w = jax.random.uniform(kw, (out_features, in_features), jnp.float32, -bound, bound)
    b = jax.random.uniform(kb, (out_features,), jnp.float32, -bound, bound)
    return w, b


if __name__ == "__main__":
    key = jax.random.PRNGKey(0)
    k_x, k_l1, k_l2, k_xs = jax.random.split(key, 4)

    B, F = 8, 32                      # small shapes consistent with Network(input_size=32)
    x = jax.random.normal(k_x, (B, F), jnp.float32)
    w1, b1 = _init_linear(k_l1, HID, F)
    w2, b2 = _init_linear(k_l2, OUT, HID)

    params = pack_params(w1, b1, w2, b2)          # packed once, not per forward call

    # --- single forward (exact module semantics) ---
    out = jax.block_until_ready(network_forward(x, params))

    # Pure-JAX reference with the same bf16 weight/activation rounding the kernel uses
    # (f32 accumulation), so the comparison is tight.
    def ref_forward(xf):
        bf = jnp.bfloat16
        h = jnp.tanh(
            jnp.dot(xf.astype(bf), w1.T.astype(bf), preferred_element_type=jnp.float32)
            + b1.astype(bf).astype(jnp.float32))
        z = (jnp.dot(h.astype(bf), w2.T.astype(bf), preferred_element_type=jnp.float32)
             + b2.astype(bf).astype(jnp.float32))
        return jax.nn.softmax(z, axis=0)          # softmax over dim=0, like nn.Softmax(dim=0)

    ref = ref_forward(x)
    assert out.shape == (B, OUT)
    assert jnp.allclose(out, ref, atol=1e-3, rtol=1e-3), "mismatch vs reference"
    # Softmax(dim=0) sanity: every column sums to ~1 (exact divide -> tight).
    assert jnp.allclose(jnp.sum(out, axis=0), jnp.ones((OUT,)), atol=1e-3)

    # --- stacked throughput path: 8 independent forwards under one grid ---
    N_GROUPS = 8
    xs = jax.random.normal(k_xs, (N_GROUPS * B, F), jnp.float32)
    outs = jax.block_until_ready(
        network_forward_stacked(xs, params, group_size=B, groups_per_tile=4))
    assert outs.shape == (N_GROUPS * B, OUT_PAD)
    for g in range(N_GROUPS):
        xg = xs[g * B:(g + 1) * B]
        got_g = outs[g * B:(g + 1) * B, :OUT]
        assert jnp.allclose(got_g, ref_forward(xg), atol=1e-3, rtol=1e-3), f"group {g} mismatch"
        assert jnp.allclose(jnp.sum(got_g, axis=0), jnp.ones((OUT,)), atol=1e-3)

    print("KERNEL_OK")
</pallas_src>

<mosaic_0001>
module attributes {stable_mosaic.version = 11 : i64} {
  func.func @network_kernel(%arg0: memref<8x32xf32, #tpu.memory_space<vmem>>, %arg1: memref<112x128xbf16, #tpu.memory_space<vmem>>, %arg2: memref<8x128xf32, #tpu.memory_space<vmem>>) attributes {dimension_semantics = [], scalar_prefetch = 0 : i64, scratch_operands = 0 : i64, tpu.core_type = #tpu.core_type<tc>} {
    %c0 = arith.constant 0 : index
    %c0_0 = arith.constant 0 : index
    %0 = vector.load %arg1[%c0, %c0_0] : memref<112x128xbf16, #tpu.memory_space<vmem>>, vector<32x128xbf16>
    %c32 = arith.constant 32 : index
    %c0_1 = arith.constant 0 : index
    %1 = vector.load %arg1[%c32, %c0_1] : memref<112x128xbf16, #tpu.memory_space<vmem>>, vector<1x128xbf16>
    %2 = arith.extf %1 : vector<1x128xbf16> to vector<1x128xf32>
    %c48 = arith.constant 48 : index
    %c0_2 = arith.constant 0 : index
    %3 = vector.load %arg1[%c48, %c0_2] : memref<112x128xbf16, #tpu.memory_space<vmem>>, vector<48x128xbf16>
    %c96 = arith.constant 96 : index
    %c0_3 = arith.constant 0 : index
    %4 = vector.load %arg1[%c96, %c0_3] : memref<112x128xbf16, #tpu.memory_space<vmem>>, vector<1x128xbf16>
    %5 = arith.extf %4 : vector<1x128xbf16> to vector<1x128xf32>
    %c0_4 = arith.constant 0 : index
    %c0_5 = arith.constant 0 : index
    %6 = vector.load %arg0[%c0_4, %c0_5] : memref<8x32xf32, #tpu.memory_space<vmem>>, vector<8x32xf32>
    %7 = arith.truncf %6 : vector<8x32xf32> to vector<8x32xbf16>
    %cst = arith.constant dense<0.000000e+00> : vector<8x128xf32>
    %8 = tpu.matmul %7, %0, %cst {dimension_numbers = #tpu.dot_dimension_numbers<[1], [0], [0], [1], [0, 0, 1, 1], [], []>} : vector<8x32xbf16>, vector<32x128xbf16>, vector<8x128xf32> -> vector<8x128xf32>
    %9 = vector.broadcast %2 : vector<1x128xf32> to vector<8x128xf32>
    %10 = arith.addf %8, %9 : vector<8x128xf32>
    %11 = math.tanh %10 : vector<8x128xf32>
    %12 = vector.extract_strided_slice %11 {offsets = [0, 0], sizes = [8, 48], strides = [1, 1]} : vector<8x128xf32> to vector<8x48xf32>
    %13 = arith.truncf %12 : vector<8x48xf32> to vector<8x48xbf16>
    %cst_6 = arith.constant dense<0.000000e+00> : vector<8x128xf32>
    %14 = tpu.matmul %13, %3, %cst_6 {dimension_numbers = #tpu.dot_dimension_numbers<[1], [0], [0], [1], [0, 0, 1, 1], [], []>} : vector<8x48xbf16>, vector<48x128xbf16>, vector<8x128xf32> -> vector<8x128xf32>
    %15 = vector.broadcast %5 : vector<1x128xf32> to vector<8x128xf32>
    %16 = arith.addf %14, %15 : vector<8x128xf32>
    %cst_7 = arith.constant dense<0xFF800000> : vector<128xf32>
    %17 = vector.multi_reduction <maximumf>, %16, %cst_7 [0] : vector<8x128xf32> to vector<128xf32>
    %18 = vector.shape_cast %17 : vector<128xf32> to vector<1x128xf32>
    %19 = vector.broadcast %18 : vector<1x128xf32> to vector<8x128xf32>
    %20 = arith.subf %16, %19 : vector<8x128xf32>
    %21 = math.exp %20 : vector<8x128xf32>
    %cst_8 = arith.constant dense<0.000000e+00> : vector<128xf32>
    %22 = vector.multi_reduction <add>, %21, %cst_8 [0] : vector<8x128xf32> to vector<128xf32>
    %23 = vector.shape_cast %22 : vector<128xf32> to vector<1x128xf32>
    %24 = vector.broadcast %23 : vector<1x128xf32> to vector<8x128xf32>
    %25 = arith.divf %21, %24 : vector<8x128xf32>
    %c0_9 = arith.constant 0 : index
    %c0_10 = arith.constant 0 : index
    %26 = vector.load %arg2[%c0_9, %c0_10] : memref<8x128xf32, #tpu.memory_space<vmem>>, vector<8x128xf32>
    tpu.vector_store %arg2[%c0_9, %c0_10], %25 {strides = array<i32>} : memref<8x128xf32, #tpu.memory_space<vmem>>, vector<8x128xf32>,
    return
  }
}

</mosaic_0001>

<bundles_post_ra>
// kernel: network_forward_padded.1
= control target key start
LH: loop header
LB: loop body
LE: loop exit
PB: predicated region body
PF: predicated region fallthrough
CT: control target
= control target key end

     0   :  { %7 = vsyncpa [#allocation3], 0  ;;  %s404_s0 = inlined_call_operand.hbm [shape: f32[8,32], index: 0, kind: input, shape index: {}]   ;;  %s405_s1 = inlined_call_operand.hbm [shape: bf16[112,128], index: 1, kind: input, shape index: {}]   ;;  %s406_s2 = inlined_call_operand.hbm [shape: f32[8,128], index: 2, kind: output, shape index: {}]  }
   0x1   :  { %8 = vsyncpa [#allocation6], 0 }
   0x2   :  { %9 = vsyncpa [#allocation4], 0  ;;  %s339_s9 = smov [#allocation2]   ;;  %s340_s11 = smov [#allocation5]  }
   0x3   :  { %s16_s10 = sshll.u32 %s339_s9, 4  ;;  %s25_s12 = sshll.u32 %s340_s11, 4  ;;  %s17_s10 = int_to_ptr.vmem [resolvable:$true] %s16_s10  ;;  %s361_s12 = int_to_ptr.vmem [resolvable:$true] %s25_s12 }
   0x4   :  { %s267_s15 = scalar_lea.hbm %s404_s0, 128 }
   0x5   :  { %p268_p0 = scmp.ne.s32.totalorder %s404_s0, %s267_s15  ;;  %p271_p1 = scmp.lt.u32.totalorder %s267_s15, %s404_s0 }
   0x7   :  { %p273_p2 = pnand %p271_p1, %p268_p0 }
   0x9   :  { %276 = shalt.err (!%p273_p2)
}
   0xa   :  { %s277_s20 = scalar_lea.vmem %s17_s10, 128  ;;  %p282_p4 = scmp.lt.s32.totalorder %s17_s10, %s17_s10 }
   0xb   :  { %p278_p3 = scmp.ne.s32.totalorder %s17_s10, %s277_s20  ;;  %p283_p5 = scmp.lt.s32.totalorder %s277_s20, %s277_s20 }
   0xd   :  { %p284_p6 = por %p283_p5, %p282_p4 }
   0xf   :  { %p285_p7 = pnand %p284_p6, %p278_p3 }
  0x11   :  { %288 = shalt.err (!%p285_p7)
}
  0x12   :  { %19 = dma.hbm_to_vmem [thread:$0]  %s404_s0, 128, %s17_s10, [#allocation3]  }
  0x13   :  { %s289_s25 = scalar_lea.hbm %s405_s1, 896 }
  0x14   :  { %p290_p8 = scmp.ne.s32.totalorder %s405_s1, %s289_s25  ;;  %p293_p9 = scmp.lt.u32.totalorder %s289_s25, %s405_s1 }
  0x16   :  { %p295_p10 = pnand %p293_p9, %p290_p8 }
  0x18   :  { %298 = shalt.err (!%p295_p10)
}
  0x19   :  { %s299_s30 = scalar_lea.vmem %s361_s12, 896  ;;  %p304_p12 = scmp.lt.s32.totalorder %s361_s12, %s361_s12 }
  0x1a   :  { %p300_p11 = scmp.ne.s32.totalorder %s361_s12, %s299_s30  ;;  %p305_p13 = scmp.lt.s32.totalorder %s299_s30, %s299_s30 }
  0x1c   :  { %p306_p0 = por %p305_p13, %p304_p12 }
  0x1e   :  { %p307_p1 = pnand %p306_p0, %p300_p11 }
  0x20   :  { %310 = shalt.err (!%p307_p1)
}
  0x21   :  { %s341_s0 = smov 64   ;;  %s342_s3 = smov 4  }
  0x22   :  { %31 = dma.hbm_to_vmem [thread:$0]  %s405_s1, 896, %s361_s12, [#allocation6], %s341_s0, %s341_s0, %s342_s3  }
  0x23   :  { %333 = dma.done.wait [#allocation3], 128  }
  0x24   :  { %334 = vsyncadd [#allocation3], 4294967168 }
  0x25   :  { %335 = dma.done.wait [#allocation6], 896  }
  0x26   :  { %336 = vsyncadd [#allocation6], 4294966400  ;;  %v343_v0 = vmov 0.0   ;;  %vm344_vm0 = vmmov 0   ;;  %v256_v1 = vld [vmem:[#allocation5] sm:$0xff]   ;;  %v257_v2 = vld [vmem:[#allocation5 + $0x8] sm:$0xff]   ;;  %v55_v8 = vlaneseq }
  0x27   :  { %231 = vmatprep.subr.bf16.mxu0 %v343_v0  ;;  %235 = vmatprep.mubr.msk.bf16.mxu0 %vm344_vm0, %v343_v0  ;;  %v53_v3 = vld [vmem:[#allocation2] sm:$0xff]  ;;  %vm71_vm1 = vcmask 261120   ;;  %v259_v6 = vld [vmem:[#allocation5 + $0x20] sm:$0xff]   ;;  %v260_v7 = vld [vmem:[#allocation5 + $0x28] sm:$0xff]   ;;  %vm139_vm2 = vcmask 392192   ;;  %s345_s1 = smov [#allocation7]  }
  0x28   :  { %239 = vmatprep.subr.bf16.mxu1 %v343_v0  ;;  %245 = vmatprep.mubr.msk.bf16.mxu1 %vm344_vm0, %v343_v0  ;;  %v54_v4 = vpack.c.bf16 %v53_v3, %v53_v3  ;;  %v258_v5 = vld [vmem:[#allocation5 + $0x18] sm:$0xff]   ;;  %v56_v9 = vshrl.u32 %v55_v8, 7  ;;  %v43_v10 = vld [vmem:[#allocation5 + $0x10] sm:$0x1]  ;;  %s207_s6 = sshll.u32 %s345_s1, 4  ;;  %s208_s6 = int_to_ptr.vmem [resolvable:$true] %s207_s6 }
  0x29   :  { %232 = vmatpush3.bf16.msra.mxu0 %v256_v1  ;;  %240 = vmatpush3.bf16.msra.mxu1 %v258_v5  ;;  %v44_v11 = vunpack.c.l.bf16 %v43_v10  ;;  %v51_v21 = vld [vmem:[#allocation5 + $0x30] sm:$0x1]  ;;  %s311_s7 = scalar_lea.vmem %s208_s6, 128  ;;  %p316_p3 = scmp.lt.s32.totalorder %s208_s6, %s208_s6 }
  0x2a   :  { %233 = vmatprep.subr.bf16.mxu0 %v343_v0  ;;  %241 = vmatprep.subr.bf16.mxu1 %v343_v0  ;;  %v57_v12 = vsub.s32 0, %v56_v9  ;;  %v52_v22 = vunpack.c.l.bf16 %v51_v21  ;;  %p312_p2 = scmp.ne.s32.totalorder %s208_s6, %s311_s7  ;;  %p317_p4 = scmp.lt.s32.totalorder %s311_s7, %s311_s7 }
  0x2c   :  { %v58_v13 = vrot.slane %v44_v11, %v57_v12  ;;  %v120_v23 = vrot.slane %v52_v22, %v57_v12  ;;  %p318_p5 = por %p317_p4, %p316_p3 }
  0x2d   :  { %234 = vmatpush3.bf16.msra.mxu0 %v257_v2  ;;  %242 = vmatpush3.bf16.msra.mxu1 %v259_v6 }
  0x2e   :  { %243 = vmatprep.subr.bf16.mxu1 %v343_v0  ;;  %p319_p6 = pnand %p318_p5, %p312_p2 }
  0x30   :  { %236 = vmatmul.mubr.msk.bf16.vlgmr.msra.gmra.mrb[0].mxu0 %vm71_vm1, %v54_v4 }
  0x31   :  { %244 = vmatpush3.bf16.msra.mxu1 %v260_v7 }
 0x103   :  { %v109_v14 = vpop.f32.mrb[0].mxu0 }
 0x104   :  { %v110_v15 = vadd.f32 %v109_v14, %v58_v13  ;;  %v237_v16 = vpop.f32.mrb[1].mxu0 }
 0x105   :  { %v112_v17 = vpop.f32.mrb[2].mxu0 }
 0x106   :  { %261 = vtanh.f32 %v110_v15  ;;  %v238_v18 = vpop.f32.mrb[3].mxu0 }
 0x110   :  { %v262_v19 = vpop.eup %261 }
 0x111   :  { %v116_v20 = vpack.c.bf16 %v262_v19, %v262_v19 }
 0x113   :  { %246 = vmatmul.mubr.msk.bf16.vlgmr.msra.gmra.mrb[0].mxu1 %vm139_vm2, %v116_v20 }
 0x1e6   :  { %v177_v24 = vpop.f32.mrb[0].mxu1 }
 0x1e7   :  { %v178_v25 = vadd.f32 %v177_v24, %v120_v23  ;;  %v247_v26 = vpop.f32.mrb[1].mxu1 }
 0x1e8   :  { %v180_v27 = vpop.f32.mrb[2].mxu1 }
 0x1e9   :  { %v183_v28 = vrot.slane %v178_v25, 4  ;;  %v248_v29 = vpop.f32.mrb[3].mxu1 }
 0x1eb   :  { %v184_v30 = vmax.f32 %v178_v25, %v183_v28 }
 0x1ed   :  { %v185_v31 = vrot.slane %v184_v30, 2 }
 0x1ef   :  { %v186_v32 = vmax.f32 %v184_v30, %v185_v31 }
 0x1f1   :  { %v187_v33 = vrot.slane %v186_v32, 1 }
 0x1f3   :  { %v188_v34 = vmax.f32 %v186_v32, %v187_v33 }
 0x1f5   :  { %v189_v35 = vsub.f32 %v178_v25, %v188_v34 }
 0x1f7   :  { %v190_v36 = vmul.f32 1.442695, %v189_v35 }
 0x1f9   :  { %263 = vpow2.f32 %v190_v36 }
 0x203   :  { %v264_v37 = vpop.eup %263 }
 0x204   :  { %v192_v38 = vrot.slane %v264_v37, 4 }
 0x206   :  { %v193_v39 = vadd.f32 %v264_v37, %v192_v38 }
 0x208   :  { %v194_v40 = vrot.slane %v193_v39, 2 }
 0x20a   :  { %v195_v41 = vadd.f32 %v194_v40, %v193_v39 }
 0x20c   :  { %v196_v42 = vrot.slane %v195_v41, 1 }
 0x20e   :  { %v197_v43 = vadd.f32 %v196_v42, %v195_v41 }
 0x210   :  { %265 = vrcp.f32 %v197_v43 }
 0x21a   :  { %v266_v44 = vpop.eup %265 }
 0x21b   :  { %v199_v45 = vmul.f32 %v266_v44, %v264_v37 }
 0x21d   :  { %200 = vst [vmem:[#allocation7] sm:$0xff] %v199_v45 }
 0x21e   :  { %322 = shalt.err (!%p319_p6)
}
 0x21f   :  { %s323_s10 = scalar_lea.hbm %s406_s2, 128 }
 0x220   :  { %p324_p7 = scmp.ne.s32.totalorder %s406_s2, %s323_s10  ;;  %p327_p8 = scmp.lt.u32.totalorder %s323_s10, %s406_s2 }
 0x222   :  { %p329_p9 = pnand %p327_p8, %p324_p7 }
 0x224   :  { %332 = shalt.err (!%p329_p9)
}
 0x225   :  { %210 = dma.vmem_to_hbm [thread:$0]  %s208_s6, 128, %s406_s2, [#allocation4]  }
 0x226   :  { %337 = dma.done.wait [#allocation4], 128  }
 0x227   :  { %338 = vsyncadd [#allocation4], 4294967168 }
 0x228   :  { %214 = vsyncpa [#allocation3], 1 }
 0x229   :  { %215 = vsyncpa [#allocation6], 1 }
 0x22a   :  { %216 = vsyncpa [#allocation4], 1 }

</bundles_post_ra>
